<compile_context>
chip_gen: v5e
topology: v5e:2x2
jax: 0.10.0
libtpu: 0.0.40
codegen_flags: <defaults>
</compile_context>

<pallas_src>
import functools

import jax
import jax.numpy as jnp
from jax import lax
from jax.experimental import pallas as pl
from jax.experimental.pallas import tpu as pltpu

BN = 512  # lane width of the 2-D slab view (multiple of 128)


def _tpu_generation() -> int:
    """Best-effort TPU generation from device_kind; 0 if unknown."""
    try:
        kind = jax.devices()[0].device_kind.lower()
    except Exception:
        return 0
    for gen in (7, 6, 5, 4):
        if f"v{gen}" in kind or f"{gen}x" in kind:
            return gen
    return 0


def _tile_config():
    """(max block rows, vmem limit bytes, allow core-parallel) per generation."""
    gen = _tpu_generation()
    if gen >= 7:   # ~3.2 TB/s HBM, 64 MiB VMEM/TC: 4 MiB blocks, use both TCs
        return 2048, 48 << 20, True
    if gen == 6:   # already ~85% of HBM roofline at 1-2 MiB blocks
        return 1024, 40 << 20, False
    return 512, 32 << 20, False  # v5e / unknown: 1 MiB blocks


def _dim_semantics(num_blocks: int, core_parallel_ok: bool):
    # On v7x, only core-parallel semantics shard the (independent) grid axis
    # across the two TensorCores; elsewhere "parallel" is sufficient.
    if (core_parallel_ok and num_blocks >= 2 and num_blocks % 2 == 0
            and hasattr(pltpu, "CORE_PARALLEL")):
        return (pltpu.CORE_PARALLEL,)
    return ("parallel",)


def _focal_loss_tile(x, t, alpha, gamma):
    """Elementwise focal loss on an f32 tile."""
    e = jnp.exp(-jnp.abs(x))                              # single exp, reused
    # Numerically-stable BCE-with-logits: max(x,0) - x*t + log1p(exp(-|x|))
    bce = jnp.maximum(x, 0.0) - x * t + jnp.log1p(e)
    # sigmoid(x) = where(x>=0, 1, e) / (1 + e)            (no second exp)
    p = jnp.where(x >= 0.0, 1.0, e) / (1.0 + e)
    # 1 - p_t  ==  p + t - 2*p*t   (saves the p_t round-trip)
    one_m = p + t - 2.0 * (p * t)

    g = float(gamma)
    if g.is_integer() and 0.0 <= g <= 8.0:
        gi = int(g)
        focal = jnp.ones_like(one_m) if gi == 0 else one_m
        for _ in range(max(gi - 1, 0)):
            focal = focal * one_m
    else:
        focal = jnp.power(one_m, g)

    loss = focal * bce
    if alpha is not None:
        a = float(alpha)
        # alpha_t = a*t + (1-a)*(1-t) == (1-a) + (2a-1)*t  (trace-time consts)
        loss = ((2.0 * a - 1.0) * t + (1.0 - a)) * loss
    return loss


def _fold8(vals):
    """Reduce a (bm, bn) f32 tile to an (8, bn) partial-sum tile."""
    bm, bn = vals.shape
    if bm % 8 == 0:
        return jnp.sum(vals.reshape(bm // 8, 8, bn), axis=0)
    # small single-block case where bm is not a multiple of 8
    s = jnp.sum(vals, axis=0, keepdims=True)               # (1, bn)
    row = lax.broadcasted_iota(jnp.int32, (8, bn), 0)
    return jnp.where(row == 0, jnp.broadcast_to(s, (8, bn)), 0.0)


def _focal_partial_kernel(x_ref, t_ref, o_ref, *, alpha, gamma, r_last, mask_last):
    """Per-block (8, BN) partial sums; only the final block masks its tail."""
    x = x_ref[...].astype(jnp.float32)
    t = t_ref[...].astype(jnp.float32)
    loss = _focal_loss_tile(x, t, alpha, gamma)
    bm, bn = x_ref.shape

    if not mask_last:
        o_ref[...] = _fold8(loss)
    else:
        i = pl.program_id(0)
        last = pl.num_programs(0) - 1

        @pl.when(i == last)
        def _():
            # Mask padded / out-of-bounds tail of the final block using the
            # per-block remainder (no global flat index -> no i32 overflow).
            row = lax.broadcasted_iota(jnp.int32, (bm, bn), 0)
            lane = lax.broadcasted_iota(jnp.int32, (bm, bn), 1)
            valid = row * bn + lane < r_last
            o_ref[...] = _fold8(jnp.where(valid, loss, 0.0))

        @pl.when(i != last)
        def _():
            o_ref[...] = _fold8(loss)


def _focal_elem_kernel(x_ref, t_ref, o_ref, *, alpha, gamma):
    x = x_ref[...].astype(jnp.float32)
    t = t_ref[...].astype(jnp.float32)
    o_ref[...] = _focal_loss_tile(x, t, alpha, gamma).astype(o_ref.dtype)


def focal_loss(logits, targets, alpha=0.25, gamma=2.0, reduction="mean",
               max_block_rows=None):
    """Pallas TPU focal loss matching PyTorch FocalLoss.forward semantics."""
    if reduction not in {"none", "mean", "sum"}:
        raise ValueError("reduction must be 'none', 'mean' or 'sum'")

    orig_shape = logits.shape
    n = int(logits.size)

    # targets.type_as(logits): only materialize a cast for non-float targets;
    # float targets stream through in their native dtype (cast to f32 in-kernel).
    if not jnp.issubdtype(targets.dtype, jnp.floating):
        targets = targets.astype(logits.dtype)

    x = logits.reshape(-1)
    t = targets.reshape(-1)

    max_bm, vmem_limit, core_ok = _tile_config()
    if max_block_rows is not None:
        max_bm = max(1, int(max_block_rows))

    # Lane-dense 2-D view. The reshape is free when n % BN == 0 (typical for
    # NCHW activations); only lane-ragged sizes fall back to a padding copy.
    if n % BN == 0:
        rows = n // BN
        padded = False
    else:
        rows = pl.cdiv(n, BN)
        pad = rows * BN - n
        x = jnp.pad(x, (0, pad))
        t = jnp.pad(t, (0, pad))
        padded = True
    x2 = x.reshape(rows, BN)
    t2 = t.reshape(rows, BN)

    # Block rows: one full-height block for small inputs, max_bm otherwise.
    # A partial final block (rows % bm != 0) uses Pallas edge-block padding:
    # OOB reads are masked in-kernel, OOB writes are dropped.
    if rows <= max_bm:
        bm, num_blocks = rows, 1
    else:
        bm = max(8, (max_bm // 8) * 8)
        num_blocks = pl.cdiv(rows, bm)
    grid = (num_blocks,)

    cparams = pltpu.CompilerParams(
        dimension_semantics=_dim_semantics(num_blocks, core_ok),
        vmem_limit_bytes=vmem_limit)

    in_specs = [pl.BlockSpec((bm, BN), lambda i: (i, 0)),
                pl.BlockSpec((bm, BN), lambda i: (i, 0))]
    in_bytes = n * (logits.dtype.itemsize + targets.dtype.itemsize)

    if reduction == "none":
        out2 = pl.pallas_call(
            functools.partial(_focal_elem_kernel, alpha=alpha, gamma=gamma),
            out_shape=jax.ShapeDtypeStruct((rows, BN), logits.dtype),
            grid_spec=pltpu.PrefetchScalarGridSpec(
                num_scalar_prefetch=0, grid=grid,
                in_specs=in_specs,
                out_specs=pl.BlockSpec((bm, BN), lambda i: (i, 0))),
            compiler_params=cparams,
            cost_estimate=pl.CostEstimate(
                flops=22 * n, transcendentals=2 * n,
                bytes_accessed=in_bytes + n * logits.dtype.itemsize),
        )(x2, t2)
        if padded:
            return out2.reshape(-1)[:n].reshape(orig_shape)
        return out2.reshape(orig_shape)

    # sum / mean: per-block (8, BN) partial sums; tiny final reduction in XLA.
    covered = num_blocks * bm * BN
    r_last = n - (num_blocks - 1) * bm * BN   # valid elements in final block
    partials = pl.pallas_call(
        functools.partial(_focal_partial_kernel, alpha=alpha, gamma=gamma,
                          r_last=r_last, mask_last=(covered != n)),
        out_shape=jax.ShapeDtypeStruct((num_blocks * 8, BN), jnp.float32),
        grid_spec=pltpu.PrefetchScalarGridSpec(
            num_scalar_prefetch=0, grid=grid,
            in_specs=in_specs,
            out_specs=pl.BlockSpec((8, BN), lambda i: (i, 0))),
        compiler_params=cparams,
        cost_estimate=pl.CostEstimate(
            flops=22 * n, transcendentals=2 * n,
            bytes_accessed=in_bytes + num_blocks * 8 * BN * 4),
    )(x2, t2)

    total = jnp.sum(partials, dtype=jnp.float32)
    if reduction == "mean":
        total = total / jnp.float32(n)
    return total.astype(logits.dtype)


def _focal_loss_ref(logits, targets, alpha=0.25, gamma=2.0, reduction="mean"):
    """Pure-JAX reference mirroring the PyTorch module."""
    x = logits.astype(jnp.float32)
    t = targets.astype(jnp.float32)
    bce = jnp.maximum(x, 0.0) - x * t + jnp.log1p(jnp.exp(-jnp.abs(x)))
    p = jax.nn.sigmoid(x)
    p_t = p * t + (1 - p) * (1 - t)
    alpha_t = alpha * t + (1 - alpha) * (1 - t) if alpha is not None else 1.0
    loss = alpha_t * jnp.power(1 - p_t, gamma) * bce
    if reduction == "mean":
        return loss.mean()
    if reduction == "sum":
        return loss.sum()
    return loss


if __name__ == "__main__":
    key = jax.random.PRNGKey(0)

    def _make(shape, salt):
        k1, k2 = jax.random.split(jax.random.fold_in(key, salt))
        logits = jax.random.normal(k1, shape, dtype=jnp.float32)
        targets = (jax.random.uniform(k2, shape) > 0.5).astype(jnp.float32)
        return logits, targets

    # 1) Spec-sized NCHW input (batch=2, channels=4, 16x16): single-block path.
    logits, targets = _make((2, 4, 16, 16), 0)
    for reduction in ("mean", "sum", "none"):
        out = jax.block_until_ready(focal_loss(logits, targets, reduction=reduction))
        ref = _focal_loss_ref(logits, targets, reduction=reduction)
        assert out.shape == ref.shape
        assert jnp.allclose(out, ref, rtol=1e-4, atol=1e-5), (reduction, out, ref)

    # 2) Multi-block path (even grid), lane-aligned, no masking needed.
    logits, targets = _make((2, 16, 32, 32), 1)            # 32768 elems -> 64 rows
    out = jax.block_until_ready(
        focal_loss(logits, targets, reduction="mean", max_block_rows=16))
    ref = _focal_loss_ref(logits, targets, reduction="mean")
    assert jnp.allclose(out, ref, rtol=1e-4, atol=1e-5), (out, ref)

    # 3) Partial final block (rows % block_rows != 0): edge-block masking.
    logits, targets = _make((2, 10, 16, 16), 2)            # 5120 elems -> 10 rows
    for reduction in ("sum", "none"):
        out = jax.block_until_ready(
            focal_loss(logits, targets, reduction=reduction, max_block_rows=8))
        ref = _focal_loss_ref(logits, targets, reduction=reduction)
        assert out.shape == ref.shape
        assert jnp.allclose(out, ref, rtol=1e-4, atol=1e-5), (reduction, out, ref)

    # 4) Lane-ragged numel (pad fallback) + alpha=None.
    logits, targets = _make((3, 5, 11, 13), 3)             # 2145 elems
    for reduction in ("mean", "none"):
        out = jax.block_until_ready(
            focal_loss(logits, targets, alpha=None, reduction=reduction))
        ref = _focal_loss_ref(logits, targets, alpha=None, reduction=reduction)
        assert out.shape == ref.shape
        assert jnp.allclose(out, ref, rtol=1e-4, atol=1e-5), (reduction, out, ref)

    print("KERNEL_OK")
</pallas_src>

<mosaic_0001>
module attributes {stable_mosaic.version = 11 : i64} {
  func.func @_focal_partial_kernel(%arg0: i32, %arg1: memref<4x512xf32, #tpu.memory_space<vmem>>, %arg2: memref<4x512xf32, #tpu.memory_space<vmem>>, %arg3: memref<8x512xf32, #tpu.memory_space<vmem>>) attributes {dimension_semantics = [#tpu.dimension_semantics<parallel>], iteration_bounds = array<i64: 1>, scalar_prefetch = 0 : i64, scratch_operands = 0 : i64, tpu.core_type = #tpu.core_type<tc>, window_params = [{transform_indices = @transform_0, window_bounds = array<i64: 4, 512>}, {transform_indices = @transform_1, window_bounds = array<i64: 4, 512>}, {transform_indices = @transform_2, window_bounds = array<i64: 8, 512>}]} {
    %c0 = arith.constant 0 : index
    %c0_0 = arith.constant 0 : index
    %0 = vector.load %arg1[%c0, %c0_0] : memref<4x512xf32, #tpu.memory_space<vmem>>, vector<4x512xf32>
    %c0_1 = arith.constant 0 : index
    %c0_2 = arith.constant 0 : index
    %1 = vector.load %arg2[%c0_1, %c0_2] : memref<4x512xf32, #tpu.memory_space<vmem>>, vector<4x512xf32>
    %2 = math.absf %0 : vector<4x512xf32>
    %cst = arith.constant 0.000000e+00 : f32
    %3 = vector.broadcast %cst : f32 to vector<4x512xf32>
    %4 = arith.subf %3, %2 : vector<4x512xf32>
    %5 = math.exp %4 : vector<4x512xf32>
    %cst_3 = arith.constant 0.000000e+00 : f32
    %6 = vector.broadcast %cst_3 : f32 to vector<4x512xf32>
    %7 = arith.maximumf %0, %6 : vector<4x512xf32>
    %8 = arith.mulf %0, %1 : vector<4x512xf32>
    %9 = arith.subf %7, %8 : vector<4x512xf32>
    %10 = math.log1p %5 : vector<4x512xf32>
    %11 = arith.addf %9, %10 : vector<4x512xf32>
    %cst_4 = arith.constant 0.000000e+00 : f32
    %12 = vector.broadcast %cst_4 : f32 to vector<4x512xf32>
    %13 = arith.cmpf oge, %0, %12 : vector<4x512xf32>
    %cst_5 = arith.constant 1.000000e+00 : f32
    %14 = vector.broadcast %cst_5 : f32 to vector<4x512xf32>
    %15 = arith.select %13, %14, %5 : vector<4x512xi1>, vector<4x512xf32>
    %cst_6 = arith.constant 1.000000e+00 : f32
    %16 = vector.broadcast %cst_6 : f32 to vector<4x512xf32>
    %17 = arith.addf %16, %5 : vector<4x512xf32>
    %18 = arith.divf %15, %17 : vector<4x512xf32>
    %19 = arith.addf %18, %1 : vector<4x512xf32>
    %20 = arith.mulf %18, %1 : vector<4x512xf32>
    %cst_7 = arith.constant 2.000000e+00 : f32
    %21 = vector.broadcast %cst_7 : f32 to vector<4x512xf32>
    %22 = arith.mulf %21, %20 : vector<4x512xf32>
    %23 = arith.subf %19, %22 : vector<4x512xf32>
    %24 = arith.mulf %23, %23 : vector<4x512xf32>
    %25 = arith.mulf %24, %11 : vector<4x512xf32>
    %cst_8 = arith.constant -5.000000e-01 : f32
    %26 = vector.broadcast %cst_8 : f32 to vector<4x512xf32>
    %27 = arith.mulf %26, %1 : vector<4x512xf32>
    %cst_9 = arith.constant 7.500000e-01 : f32
    %28 = vector.broadcast %cst_9 : f32 to vector<4x512xf32>
    %29 = arith.addf %27, %28 : vector<4x512xf32>
    %30 = arith.mulf %29, %25 : vector<4x512xf32>
    %cst_10 = arith.constant dense<0.000000e+00> : vector<512xf32>
    %31 = vector.multi_reduction <add>, %30, %cst_10 [0] : vector<4x512xf32> to vector<512xf32>
    %32 = vector.shape_cast %31 : vector<512xf32> to vector<1x512xf32>
    %33 = tpu.iota {dimensions = array<i32: 0>} : vector<8x512xi32>
    %c0_i32 = arith.constant 0 : i32
    %34 = vector.broadcast %c0_i32 : i32 to vector<8x512xi32>
    %35 = arith.cmpi eq, %33, %34 : vector<8x512xi32>
    %36 = vector.shape_cast %32 : vector<1x512xf32> to vector<1x512xf32>
    %37 = vector.broadcast %36 : vector<1x512xf32> to vector<8x512xf32>
    %cst_11 = arith.constant 0.000000e+00 : f32
    %38 = vector.broadcast %cst_11 : f32 to vector<8x512xf32>
    %39 = arith.select %35, %37, %38 : vector<8x512xi1>, vector<8x512xf32>
    %c0_12 = arith.constant 0 : index
    %c0_13 = arith.constant 0 : index
    %40 = vector.load %arg3[%c0_12, %c0_13] : memref<8x512xf32, #tpu.memory_space<vmem>>, vector<8x512xf32>
    tpu.vector_store %arg3[%c0_12, %c0_13], %39 {strides = array<i32>} : memref<8x512xf32, #tpu.memory_space<vmem>>, vector<8x512xf32>,
    return
  }
  func.func @transform_0(%arg0: i32) -> (i32, i32) {
    %c0_i32 = arith.constant 0 : i32
    %c0_i32_0 = arith.constant 0 : i32
    return %arg0, %c0_i32 : i32, i32
  }
  func.func @transform_1(%arg0: i32) -> (i32, i32) {
    %c0_i32 = arith.constant 0 : i32
    %c0_i32_0 = arith.constant 0 : i32
    return %arg0, %c0_i32 : i32, i32
  }
  func.func @transform_2(%arg0: i32) -> (i32, i32) {
    %c0_i32 = arith.constant 0 : i32
    %c0_i32_0 = arith.constant 0 : i32
    return %arg0, %c0_i32 : i32, i32
  }
}

</mosaic_0001>

<bundles_post_ra>
// kernel: tpu_custom_call.1
= control target key start
LH: loop header
LB: loop body
LE: loop exit
PB: predicated region body
PF: predicated region fallthrough
CT: control target
= control target key end

     0   :  { %7 = vsyncpa [#allocation3], 0  ;;  %s364_s0 = inlined_call_operand.hbm [shape: f32[4,512], index: 0, kind: input, shape index: {}]   ;;  %s365_s1 = inlined_call_operand.hbm [shape: f32[4,512], index: 1, kind: input, shape index: {}]   ;;  %s366_s2 = inlined_call_operand.hbm [shape: f32[8,512], index: 2, kind: output, shape index: {}]  }
   0x1   :  { %8 = vsyncpa [#allocation6], 0 }
   0x2   :  { %9 = vsyncpa [#allocation4], 0  ;;  %s15_s11 = sshll.u32 %s364_s0, 4  ;;  %s296_s12 = smov [#allocation2]   ;;  %s16_s11 = int_to_ptr.hbm [resolvable:$true] %s15_s11 }
   0x3   :  { %s17_s13 = sshll.u32 %s296_s12, 4  ;;  %s26_s16 = sshll.u32 %s365_s1, 4  ;;  %s18_s13 = int_to_ptr.vmem [resolvable:$true] %s17_s13  ;;  %s27_s16 = int_to_ptr.hbm [resolvable:$true] %s26_s16 }
   0x4   :  { %20 = dma.hbm_to_vmem [thread:$0]  %s16_s11, 256, %s18_s13, [#allocation3]  }
   0x5   :  { %s297_s17 = smov [#allocation5]  }
   0x6   :  { %s28_s18 = sshll.u32 %s297_s17, 4  ;;  %s29_s18 = int_to_ptr.vmem [resolvable:$true] %s28_s18 }
   0x7   :  { %31 = dma.hbm_to_vmem [thread:$0]  %s27_s16, 256, %s29_s18, [#allocation6]  }
   0x8   :  { %290 = dma.done.wait [#allocation3], 256  }
   0x9   :  { %291 = vsyncadd [#allocation3], 4294967040 }
   0xa   :  { %292 = dma.done.wait [#allocation6], 256  }
   0xb   :  { %293 = vsyncadd [#allocation6], 4294967040  ;;  %v320_v0 = vld [vmem:[#allocation2] sm:$0xff]  ;;  %v322_v1 = vld [vmem:[#allocation2 + $0x8] sm:$0xff]  ;;  %vm145_vm12 = vcmask 1043456   ;;  %s298_s0 = smov [#allocation7]  }
   0xc   :  { %v44_v2 = vand.u32 2147483647, %v320_v0  ;;  %v45_v3 = vand.u32 2147483647, %v322_v1  ;;  %v42_v13 = vld [vmem:[#allocation5] sm:$0xff]  ;;  %v52_v14 = vmax.f32 %v320_v0, 0.0 }
   0xd   :  { %v54_v15 = vmul.f32 %v42_v13, %v320_v0  ;;  %vm78_vm2 = vcmp.ge.f32.partialorder %v320_v0, 0.0  ;;  %v53_v31 = vmax.f32 %v322_v1, 0.0  ;;  %vm79_vm6 = vcmp.ge.f32.partialorder %v322_v1, 0.0  ;;  %v43_v35 = vld [vmem:[#allocation5 + $0x8] sm:$0xff]  ;;  %s190_s1 = sshll.u32 %s298_s0, 4  ;;  %s192_s21 = sshll.u32 %s366_s2, 4  ;;  %s191_s1 = int_to_ptr.vmem [resolvable:$true] %s190_s1  ;;  %s193_s21 = int_to_ptr.hbm [resolvable:$true] %s192_s21 }
   0xe   :  { %v46_v4 = vsub.f32 0.0, %v44_v2  ;;  %v47_v5 = vsub.f32 0.0, %v45_v3  ;;  %v55_v38 = vmul.f32 %v43_v35, %v322_v1  ;;  %v126_v63 = vmul.f32 -0.5, %v42_v13 }
   0xf   :  { %v56_v53 = vsub.f32 %v52_v14, %v54_v15 }
  0x10   :  { %v48_v6 = vmul.f32 1.442695, %v46_v4  ;;  %v50_v7 = vmul.f32 1.442695, %v47_v5  ;;  %v57_v61 = vsub.f32 %v53_v31, %v55_v38 }
  0x12   :  { %206 = vpow2.f32 %v48_v6  ;;  %v127_v6 = vmul.f32 -0.5, %v43_v35 }
  0x13   :  { %208 = vpow2.f32 %v50_v7 }
  0x14   :  { %v129_v14 = vadd.f32 0.75, %v127_v6 }
  0x18   :  { %v207_v8 = vpop.eup %206 }
  0x19   :  { %v209_v9 = vpop.eup %208  ;;  %v58_v10 = vadd.f32 1.0, %v207_v8  ;;  %v61_v18 = vmul.f32 -0.5, %v207_v8  ;;  %v64_v33 = vand.u32 2147483647, %v207_v8  ;;  %v80_v37 = vsel %vm78_vm2, 1.0, %v207_v8 }
  0x1a   :  { %v67_v11 = vadd.f32 1.0, %v209_v9  ;;  %v70_v23 = vmul.f32 -0.5, %v209_v9  ;;  %v73_v44 = vand.u32 2147483647, %v209_v9  ;;  %v81_v49 = vsel %vm79_vm6, 1.0, %v209_v9 }
  0x1b   :  { %210 = vrcp.f32 %v58_v10  ;;  %vm89_vm0 = vweird.f32 %v58_v10  ;;  %v93_v19 = vand.u32 2147483647, %v58_v10  ;;  %v95_v20 = vand.u32 2147483648, %v58_v10 }
  0x1c   :  { %212 = vrcp.f32 %v67_v11  ;;  %vm104_vm3 = vweird.f32 %v67_v11  ;;  %v110_v24 = vand.u32 2147483648, %v67_v11  ;;  %v108_v27 = vand.u32 2147483647, %v67_v11 }
  0x1d   :  { %214 = vlog2.f32 %v58_v10  ;;  %v62_v28 = vadd.f32 1.0, %v61_v18  ;;  %v96_v30 = vor.u32 1.1754944e-38, %v95_v20  ;;  %vm94_vm7 = vcmp.eq.f32.partialorder %v93_v19, 8.507059e+37 }
  0x1e   :  { %216 = vlog2.f32 %v67_v11  ;;  %v71_v39 = vadd.f32 1.0, %v70_v23  ;;  %v111_v41 = vor.u32 1.1754944e-38, %v110_v24  ;;  %vm109_vm9 = vcmp.eq.f32.partialorder %v108_v27, 8.507059e+37 }
  0x1f   :  { %v63_v47 = vmul.f32 %v207_v8, %v62_v28  ;;  %vm349_vm10 = vcmp.lt.f32.partialorder %v64_v33, 0.0004427343  ;;  %vm74_vm11 = vcmp.lt.f32.partialorder %v73_v44, 0.0004427343  ;;  %v128_v8 = vadd.f32 0.75, %v126_v63 }
  0x20   :  { %v72_v55 = vmul.f32 %v209_v9, %v71_v39  ;;  %v174_v24 = vlaneseq }
  0x21   :  { %v211_v12 = vpop.eup %210 }
  0x22   :  { %v85_v16 = vmul.f32 %v211_v12, %v58_v10  ;;  %v213_v17 = vpop.eup %212  ;;  %vm90_vm1 = vweird.f32 %v211_v12 }
  0x23   :  { %v100_v22 = vmul.f32 %v213_v17, %v67_v11  ;;  %vm105_vm4 = vweird.f32 %v213_v17  ;;  %vm330_vm5 = vmor %vm89_vm0, %vm90_vm1  ;;  %v215_v32 = vpop.eup %214 }
  0x24   :  { %v86_v21 = vsub.f32 1.0, %v85_v16  ;;  %vm341_vm8 = vmor %vm104_vm3, %vm105_vm4  ;;  %v217_v42 = vpop.eup %216  ;;  %v60_v46 = vmul.f32 0.6931472, %v215_v32 }
  0x25   :  { %v101_v26 = vsub.f32 1.0, %v100_v22  ;;  %v69_v54 = vmul.f32 0.6931472, %v217_v42 }
  0x26   :  { %v87_v25 = vmul.f32 %v211_v12, %v86_v21  ;;  %v66_v60 = vsel %vm349_vm10, %v63_v47, %v60_v46 }
  0x27   :  { %v102_v36 = vmul.f32 %v213_v17, %v101_v26  ;;  %v75_v2 = vsel %vm74_vm11, %v72_v55, %v69_v54  ;;  %v76_v3 = vadd.f32 %v66_v60, %v56_v53 }
  0x28   :  { %v88_v34 = vadd.f32 %v211_v12, %v87_v25  ;;  %v77_v9 = vadd.f32 %v75_v2, %v57_v61 }
  0x29   :  { %v103_v45 = vadd.f32 %v213_v17, %v102_v36 }
  0x2a   :  { %v92_v43 = vsel %vm330_vm5, %v211_v12, %v88_v34 }
  0x2b   :  { %v97_v48 = vsel %vm94_vm7, %v96_v30, %v92_v43  ;;  %v107_v52 = vsel %vm341_vm8, %v213_v17, %v103_v45 }
  0x2c   :  { %v98_v51 = vmul.f32 %v97_v48, %v80_v37  ;;  %v112_v56 = vsel %vm109_vm9, %v111_v41, %v107_v52 }
  0x2d   :  { %v113_v59 = vmul.f32 %v112_v56, %v81_v49 }
  0x2e   :  { %v114_v57 = vadd.f32 %v98_v51, %v42_v13  ;;  %v116_v58 = vmul.f32 %v98_v51, %v42_v13 }
  0x2f   :  { %v115_v0 = vadd.f32 %v113_v59, %v43_v35  ;;  %v117_v1 = vmul.f32 %v113_v59, %v43_v35  ;;  %v175_v35 = vshrl.u32 %v174_v24, 7 }
  0x30   :  { %v118_v62 = vmul.f32 2.0, %v116_v58 }
  0x31   :  { %v119_v5 = vmul.f32 2.0, %v117_v1  ;;  %vm176_vm13 = vcmp.eq.s32.totalorder %v175_v35, 0 }
  0x32   :  { %v120_v4 = vsub.f32 %v114_v57, %v118_v62 }
  0x33   :  { %v121_v10 = vsub.f32 %v115_v0, %v119_v5 }
  0x34   :  { %v122_v7 = vmul.f32 %v120_v4, %v120_v4 }
  0x35   :  { %v123_v12 = vmul.f32 %v121_v10, %v121_v10 }
  0x36   :  { %v124_v11 = vmul.f32 %v122_v7, %v76_v3 }
  0x37   :  { %v125_v16 = vmul.f32 %v123_v12, %v77_v9 }
  0x38   :  { %v130_v15 = vmul.f32 %v128_v8, %v124_v11 }
  0x39   :  { %v131_v17 = vmul.f32 %v129_v14, %v125_v16 }
  0x3a   :  { %134 = vst [vmem:[#allocation1] ss:$2 sm:$0xff] %v130_v15 }
  0x3b   :  { %136 = vst [vmem:[#allocation1 + $0x10] ss:$2 sm:$0xff] %v131_v17 }
  0x41   :  { %v137_v13 = vld.sshfl [vmem:[#allocation1] sm:$0xff pattern:$0x75316420]  ;;  %v138_v18 = vld.sshfl [vmem:[#allocation1 + $0x8] sm:$0xff pattern:$0x75316420] }
  0x42   :  { %v146_v19 = vsel %vm145_vm12, %v137_v13, 0.0  ;;  %v153_v20 = vsel %vm145_vm12, %v138_v18, 0.0  ;;  %v139_v23 = vld.sshfl [vmem:[#allocation1 + $0x10] sm:$0xff pattern:$0x75316420] }
  0x43   :  { %v147_v21 = vrot.slane %v146_v19, 4  ;;  %v154_v22 = vrot.slane %v153_v20, 4  ;;  %v160_v25 = vsel %vm145_vm12, %v139_v23, 0.0  ;;  %v140_v26 = vld.sshfl [vmem:[#allocation1 + $0x18] sm:$0xff pattern:$0x75316420] }
  0x44   :  { %v161_v29 = vrot.slane %v160_v25, 4  ;;  %v167_v30 = vsel %vm145_vm12, %v140_v26, 0.0 }
  0x45   :  { %v148_v27 = vadd.f32 %v147_v21, %v146_v19  ;;  %v155_v28 = vadd.f32 %v154_v22, %v153_v20  ;;  %v168_v31 = vrot.slane %v167_v30, 4 }
  0x46   :  { %v162_v34 = vadd.f32 %v161_v29, %v160_v25 }
  0x47   :  { %v149_v32 = vrot.slane %v148_v27, 2  ;;  %v156_v33 = vrot.slane %v155_v28, 2  ;;  %v169_v36 = vadd.f32 %v168_v31, %v167_v30 }
  0x48   :  { %v163_v39 = vrot.slane %v162_v34, 2 }
  0x49   :  { %v150_v37 = vadd.f32 %v149_v32, %v148_v27  ;;  %v157_v38 = vadd.f32 %v156_v33, %v155_v28  ;;  %v170_v40 = vrot.slane %v169_v36, 2 }
  0x4a   :  { %v164_v43 = vadd.f32 %v163_v39, %v162_v34 }
  0x4b   :  { %v151_v41 = vrot.slane %v150_v37, 1  ;;  %v158_v42 = vrot.slane %v157_v38, 1  ;;  %v171_v44 = vadd.f32 %v170_v40, %v169_v36 }
  0x4c   :  { %v165_v47 = vrot.slane %v164_v43, 1 }
  0x4d   :  { %v152_v45 = vadd.f32 %v151_v41, %v150_v37  ;;  %v159_v46 = vadd.f32 %v158_v42, %v157_v38  ;;  %v172_v48 = vrot.slane %v171_v44, 1 }
  0x4e   :  { %v166_v51 = vadd.f32 %v165_v47, %v164_v43 }
  0x4f   :  { %v177_v49 = vsel %vm176_vm13, %v152_v45, 0.0  ;;  %v178_v50 = vsel %vm176_vm13, %v159_v46, 0.0  ;;  %v173_v52 = vadd.f32 %v172_v48, %v171_v44 }
  0x50   :  { %181 = vst [vmem:[#allocation7] sm:$0xff] %v177_v49  ;;  %v179_v53 = vsel %vm176_vm13, %v166_v51, 0.0 }
  0x51   :  { %182 = vst [vmem:[#allocation7 + $0x8] sm:$0xff] %v178_v50  ;;  %v180_v54 = vsel %vm176_vm13, %v173_v52, 0.0 }
  0x52   :  { %183 = vst [vmem:[#allocation7 + $0x10] sm:$0xff] %v179_v53 }
  0x53   :  { %184 = vst [vmem:[#allocation7 + $0x18] sm:$0xff] %v180_v54 }
  0x54   :  { %195 = dma.vmem_to_hbm [thread:$0]  %s191_s1, 512, %s193_s21, [#allocation4]  }
  0x55   :  { %294 = dma.done.wait [#allocation4], 512  }
  0x56   :  { %295 = vsyncadd [#allocation4], 4294966784 }
  0x57   :  { %200 = vsyncpa [#allocation3], 1 }
  0x58   :  { %201 = vsyncpa [#allocation6], 1 }
  0x59   :  { %202 = vsyncpa [#allocation4], 1 }

</bundles_post_ra>
